<compile_context>
chip_gen: v7x
topology: tpu7x:2x2x1
jax: 0.10.0
libtpu: 0.0.40
codegen_flags: <defaults>
</compile_context>

<pallas_src>
import jax
import jax.numpy as jnp
from jax.experimental import pallas as pl
from jax.experimental.pallas import tpu as pltpu


def aux_head2_kernel(x_ref, w1_ref, b1_ref, w2_ref, b2_ref,
                     logits_ref, probs_ref):
    # ---- Linear(in_ch -> 128) + ReLU (bf16 MXU feeds, f32 accumulate) ----
    x = x_ref[...].astype(jnp.bfloat16)                                  # (tb, F)
    h = jnp.dot(x, w1_ref[...], preferred_element_type=jnp.float32)     # (tb, H)
    h = h + b1_ref[...]
    h = jnp.maximum(h, 0.0)                                              # ReLU

    # ---- Linear(128 -> num_aux) ----
    logits = jnp.dot(h.astype(jnp.bfloat16), w2_ref[...],
                     preferred_element_type=jnp.float32)                 # (tb, A)
    logits = logits + b2_ref[...]

    # ---- Softmax over the aux axis (dim=1), numerically stable, in f32 ----
    m = jnp.max(logits, axis=-1, keepdims=True)
    e = jnp.exp(logits - m)
    probs = e / jnp.sum(e, axis=-1, keepdims=True)

    logits_ref[...] = logits.astype(logits_ref.dtype)
    probs_ref[...] = probs.astype(probs_ref.dtype)


def auxiliary_head2_forward(x, kernel_params, *, block_b=256):
    """x: (B, in_ch) f32. Returns (logits, probs), each (B, num_aux) f32."""
    w1, b1, w2, b2 = kernel_params     # w1:(F,H) bf16, b1:(1,H) f32, w2:(H,A) bf16, b2:(1,A) f32
    B, F = x.shape
    H = w1.shape[1]
    A = w2.shape[1]

    flops = 2 * B * (F * H + H * A)
    bytes_accessed = int(x.size * x.dtype.itemsize
                         + w1.size * w1.dtype.itemsize
                         + b1.size * b1.dtype.itemsize
                         + w2.size * w2.dtype.itemsize
                         + b2.size * b2.dtype.itemsize
                         + 2 * B * A * 4)
    cost = pl.CostEstimate(flops=flops, transcendentals=B * A,
                           bytes_accessed=bytes_accessed)

    if B <= block_b:
        # Tiny batch: one block, no grid (avoids per-step pipeline overhead).
        full = lambda shape: pl.BlockSpec(shape, lambda: (0,) * len(shape))
        grid = ()
        in_specs = [full((B, F)), full((F, H)), full((1, H)),
                    full((H, A)), full((1, A))]
        out_specs = (full((B, A)), full((B, A)))
        cparams = pltpu.CompilerParams()
    else:
        # Large batch: tile batch axis; weights/biases have a constant block
        # index (fetched once, VMEM-resident); batch axis is 'parallel' so v7x
        # shards it across its two TensorCores.
        tb = block_b                                   # multiple of 8
        grid = (pl.cdiv(B, tb),)
        in_specs = [pl.BlockSpec((tb, F), lambda i: (i, 0)),
                    pl.BlockSpec((F, H), lambda i: (0, 0)),
                    pl.BlockSpec((1, H), lambda i: (0, 0)),
                    pl.BlockSpec((H, A), lambda i: (0, 0)),
                    pl.BlockSpec((1, A), lambda i: (0, 0))]
        out_specs = (pl.BlockSpec((tb, A), lambda i: (i, 0)),
                     pl.BlockSpec((tb, A), lambda i: (i, 0)))
        cparams = pltpu.CompilerParams(dimension_semantics=("parallel",))

    return pl.pallas_call(
        aux_head2_kernel,
        out_shape=(jax.ShapeDtypeStruct((B, A), jnp.float32),
                   jax.ShapeDtypeStruct((B, A), jnp.float32)),
        grid=grid,
        in_specs=in_specs,
        out_specs=out_specs,
        compiler_params=cparams,
        cost_estimate=cost,
    )(x, w1, b1, w2, b2)


def init_params(key, in_ch=2048, hidden=128, num_aux=5):
    """f32 master params in PyTorch layout: w1 (H,F), b1 (H,), w2 (A,H), b2 (A,)."""
    k1, k2, k3, k4 = jax.random.split(key, 4)
    bound1 = 1.0 / (in_ch ** 0.5)
    bound2 = 1.0 / (hidden ** 0.5)
    w1 = jax.random.uniform(k1, (hidden, in_ch), jnp.float32, -bound1, bound1)
    b1 = jax.random.uniform(k2, (hidden,), jnp.float32, -bound1, bound1)
    w2 = jax.random.uniform(k3, (num_aux, hidden), jnp.float32, -bound2, bound2)
    b2 = jax.random.uniform(k4, (num_aux,), jnp.float32, -bound2, bound2)
    return (w1, b1, w2, b2)


def prepare_kernel_params(params):
    """Bake kernel-layout params ONCE (offline): transposed, bf16 weights."""
    w1, b1, w2, b2 = params
    return (jnp.asarray(w1.T, jnp.bfloat16),
            jnp.asarray(b1.reshape(1, -1), jnp.float32),
            jnp.asarray(w2.T, jnp.bfloat16),
            jnp.asarray(b2.reshape(1, -1), jnp.float32))


def auxiliary_head2_reference(x, params):
    """Pure-JAX f32 reference of the PyTorch forward."""
    w1, b1, w2, b2 = params
    h = jnp.maximum(x @ w1.T + b1, 0.0)
    logits = x_aux = h @ w2.T + b2        # .squeeze() is identity for these shapes
    probs = jax.nn.softmax(x_aux, axis=1)
    return logits, probs


if __name__ == "__main__":
    key = jax.random.PRNGKey(0)
    kx, kp = jax.random.split(key)

    B, in_ch, num_aux = 2, 2048, 5        # module default in_ch=2048, small batch
    x = jax.random.normal(kx, (B, in_ch), jnp.float32)
    params = init_params(kp, in_ch=in_ch, hidden=128, num_aux=num_aux)
    kparams = prepare_kernel_params(params)   # bf16 weights baked once, offline

    logits, probs = auxiliary_head2_forward(x, kparams)
    logits, probs = jax.block_until_ready((logits, probs))

    ref_logits, ref_probs = auxiliary_head2_reference(x, params)
    assert logits.shape == (B, num_aux) and probs.shape == (B, num_aux)
    # bf16 MXU operands (f32 accumulate) -> looser tolerance than pure f32.
    assert jnp.allclose(logits, ref_logits, atol=5e-2, rtol=5e-2)
    assert jnp.allclose(probs, ref_probs, atol=1e-2, rtol=1e-2)
    assert jnp.allclose(jnp.sum(probs, axis=1), 1.0, atol=1e-3)

    print("KERNEL_OK")
</pallas_src>

<mosaic_0001>
module attributes {stable_mosaic.version = 11 : i64} {
  func.func @aux_head2_kernel(%arg0: memref<2x2048xf32, #tpu.memory_space<vmem>>, %arg1: memref<2048x128xbf16, #tpu.memory_space<vmem>>, %arg2: memref<1x128xf32, #tpu.memory_space<vmem>>, %arg3: memref<128x5xbf16, #tpu.memory_space<vmem>>, %arg4: memref<1x5xf32, #tpu.memory_space<vmem>>, %arg5: memref<2x5xf32, #tpu.memory_space<vmem>>, %arg6: memref<2x5xf32, #tpu.memory_space<vmem>>) attributes {dimension_semantics = [], scalar_prefetch = 0 : i64, scratch_operands = 0 : i64, tpu.core_type = #tpu.core_type<tc>} {
    %c0 = arith.constant 0 : index
    %c0_0 = arith.constant 0 : index
    %0 = vector.load %arg0[%c0, %c0_0] : memref<2x2048xf32, #tpu.memory_space<vmem>>, vector<2x2048xf32>
    %1 = arith.truncf %0 : vector<2x2048xf32> to vector<2x2048xbf16>
    %c0_1 = arith.constant 0 : index
    %c0_2 = arith.constant 0 : index
    %2 = vector.load %arg1[%c0_1, %c0_2] : memref<2048x128xbf16, #tpu.memory_space<vmem>>, vector<2048x128xbf16>
    %cst = arith.constant dense<0.000000e+00> : vector<2x128xf32>
    %3 = tpu.matmul %1, %2, %cst {dimension_numbers = #tpu.dot_dimension_numbers<[1], [0], [0], [1], [0, 0, 1, 1], [], []>} : vector<2x2048xbf16>, vector<2048x128xbf16>, vector<2x128xf32> -> vector<2x128xf32>
    %c0_3 = arith.constant 0 : index
    %c0_4 = arith.constant 0 : index
    %4 = vector.load %arg2[%c0_3, %c0_4] : memref<1x128xf32, #tpu.memory_space<vmem>>, vector<1x128xf32>
    %5 = vector.broadcast %4 : vector<1x128xf32> to vector<2x128xf32>
    %6 = arith.addf %3, %5 : vector<2x128xf32>
    %cst_5 = arith.constant 0.000000e+00 : f32
    %7 = vector.broadcast %cst_5 : f32 to vector<2x128xf32>
    %8 = arith.maximumf %6, %7 : vector<2x128xf32>
    %9 = arith.truncf %8 : vector<2x128xf32> to vector<2x128xbf16>
    %c0_6 = arith.constant 0 : index
    %c0_7 = arith.constant 0 : index
    %10 = vector.load %arg3[%c0_6, %c0_7] : memref<128x5xbf16, #tpu.memory_space<vmem>>, vector<128x5xbf16>
    %cst_8 = arith.constant dense<0.000000e+00> : vector<2x5xf32>
    %11 = tpu.matmul %9, %10, %cst_8 {dimension_numbers = #tpu.dot_dimension_numbers<[1], [0], [0], [1], [0, 0, 1, 1], [], []>} : vector<2x128xbf16>, vector<128x5xbf16>, vector<2x5xf32> -> vector<2x5xf32>
    %c0_9 = arith.constant 0 : index
    %c0_10 = arith.constant 0 : index
    %12 = vector.load %arg4[%c0_9, %c0_10] : memref<1x5xf32, #tpu.memory_space<vmem>>, vector<1x5xf32>
    %13 = vector.broadcast %12 : vector<1x5xf32> to vector<2x5xf32>
    %14 = arith.addf %11, %13 : vector<2x5xf32>
    %cst_11 = arith.constant dense<0xFF800000> : vector<2xf32>
    %15 = vector.multi_reduction <maximumf>, %14, %cst_11 [1] : vector<2x5xf32> to vector<2xf32>
    %16 = vector.shape_cast %15 : vector<2xf32> to vector<2x1xf32>
    %17 = vector.broadcast %16 : vector<2x1xf32> to vector<2x5xf32>
    %18 = arith.subf %14, %17 : vector<2x5xf32>
    %19 = math.exp %18 : vector<2x5xf32>
    %cst_12 = arith.constant dense<0.000000e+00> : vector<2xf32>
    %20 = vector.multi_reduction <add>, %19, %cst_12 [1] : vector<2x5xf32> to vector<2xf32>
    %21 = vector.shape_cast %20 : vector<2xf32> to vector<2x1xf32>
    %22 = vector.broadcast %21 : vector<2x1xf32> to vector<2x5xf32>
    %23 = arith.divf %19, %22 : vector<2x5xf32>
    %c0_13 = arith.constant 0 : index
    %c0_14 = arith.constant 0 : index
    %24 = vector.load %arg5[%c0_13, %c0_14] : memref<2x5xf32, #tpu.memory_space<vmem>>, vector<2x5xf32>
    tpu.vector_store %arg5[%c0_13, %c0_14], %14 {strides = array<i32>} : memref<2x5xf32, #tpu.memory_space<vmem>>, vector<2x5xf32>,
    %c0_15 = arith.constant 0 : index
    %c0_16 = arith.constant 0 : index
    %25 = vector.load %arg6[%c0_15, %c0_16] : memref<2x5xf32, #tpu.memory_space<vmem>>, vector<2x5xf32>
    tpu.vector_store %arg6[%c0_15, %c0_16], %23 {strides = array<i32>} : memref<2x5xf32, #tpu.memory_space<vmem>>, vector<2x5xf32>,
    return
  }
}

</mosaic_0001>

<bundles_post_ra>
// kernel: tpu_custom_call.1
= control target key start
LH: loop header
LB: loop body
LE: loop exit
PB: predicated region body
PF: predicated region fallthrough
CT: control target
= control target key end

     0   :  { %12 = vsyncpa [#allocation3], 0  ;;  %s2356_s0 = inlined_call_operand.vmem [shape: f32[2,2048], index: 0, kind: input, shape index: {}]   ;;  %s2357_s1 = inlined_call_operand.hbm [shape: bf16[2048,128], index: 1, kind: input, shape index: {}]   ;;  %s2358_s2 = inlined_call_operand.vmem [shape: f32[1,128], index: 2, kind: input, shape index: {}]   ;;  %s2359_s3 = inlined_call_operand.vmem [shape: bf16[128,5], index: 3, kind: input, shape index: {}]   ;;  %s2360_s4 = inlined_call_operand.vmem [shape: f32[1,5], index: 4, kind: input, shape index: {}]   ;;  %s2361_s5 = inlined_call_operand.hbm [shape: f32[2,5], index: 5, kind: output, shape index: {0}]   ;;  %s2362_s6 = inlined_call_operand.hbm [shape: f32[2,5], index: 6, kind: output, shape index: {1}]  }
   0x1   :  { %13 = vsyncpa [#allocation4], 0 }
   0x2   :  { %14 = vsyncpa [#allocation7], 0  ;;  %s2221_s21 = smov [#allocation2]   ;;  %s2149_s25 = scalar_lea.hbm %s2357_s1, 16384 }
   0x3   :  { %s22_s22 = sshll.u32 %s2221_s21, 4  ;;  %p2150_p0 = scmp.ne.s32.totalorder %s2357_s1, %s2149_s25  ;;  %s23_s22 = int_to_ptr.vmem [resolvable:$true] %s22_s22 }
   0x4   :  { %p2153_p1 = scmp.lt.u32.totalorder %s2149_s25, %s2357_s1 }
   0x6   :  { %p2155_p2 = pnand %p2153_p1, %p2150_p0 }
   0x8   :  { %2158 = shalt.err (!%p2155_p2)
}
   0x9   :  { %s2159_s30 = scalar_lea.vmem %s23_s22, 16384  ;;  %p2164_p4 = scmp.lt.s32.totalorder %s23_s22, %s23_s22 }
   0xa   :  { %p2160_p3 = scmp.ne.s32.totalorder %s23_s22, %s2159_s30  ;;  %p2165_p5 = scmp.lt.s32.totalorder %s2159_s30, %s2159_s30 }
   0xc   :  { %p2166_p6 = por %p2165_p5, %p2164_p4 }
   0xe   :  { %p2167_p7 = pnand %p2166_p6, %p2160_p3 }
  0x10   :  { %2170 = shalt.err (!%p2167_p7)
}
  0x11   :  { %s2222_s7 = smov 64   ;;  %s2223_s8 = smov 4  }
  0x12   :  { %28 = dma.hbm_to_vmem [thread:$0]  %s2357_s1, 16384, %s23_s22, [#allocation3], %s2222_s7, %s2222_s7, %s2223_s8  }
  0x13   :  { %2215 = dma.done.wait [#allocation3], 16384  }
  0x14   :  { %2216 = vsyncadd [#allocation3], 4294950912  ;;  %v2005_v0 = vld [vmem:[#allocation2 + $0x40] sm:$0xff]   ;;  %v2009_v4 = vld [vmem:[#allocation2 + $0x48] sm:$0xff]   ;;  %v2224_v22 = vmov 1983009808   ;;  %v51_v24 = vlaneseq }
  0x15   :  { %v2006_v1 = vld [vmem:[#allocation2 + $0xc0] sm:$0xff]   ;;  %1792 = vmatprep.subr.bf16.mxu0 %v2005_v0  ;;  %v2010_v5 = vld [vmem:[#allocation2 + $0xc8] sm:$0xff]   ;;  %v2013_v8 = vld [vmem:[#allocation2 + $0x50] sm:$0xff]   ;;  %v49_v23 = vunpack.c.l.s4 %v2224_v22  ;;  %vm2226_vm0 = vmmov 0   ;;  %vm1611_vm1 = vcmask 33792  }
  0x16   :  { %v2007_v2 = vld [vmem:[#allocation2] sm:$0xff]   ;;  %1814 = vmatprep.subr.bf16.mxu1 %v2006_v1  ;;  %v2011_v6 = vld [vmem:[#allocation2 + $0x8] sm:$0xff]   ;;  %v2014_v9 = vld [vmem:[#allocation2 + $0xd0] sm:$0xff]   ;;  %v52_v30 = vshrl.u32 %v51_v24, 7 }
  0x17   :  { %v2008_v3 = vld [vmem:[#allocation2 + $0x80] sm:$0xff]   ;;  %1793 = vmatpush3.bf16.msra.mxu0 %v2007_v2  ;;  %v2012_v7 = vld [vmem:[#allocation2 + $0x88] sm:$0xff]   ;;  %v2015_v10 = vld [vmem:[#allocation2 + $0x10] sm:$0xff]   ;;  %v50_v29 = vunpack.c.0.s8 %v49_v23 }
  0x18   :  { %1815 = vmatpush3.bf16.msra.mxu1 %v2008_v3  ;;  %1794 = vmatprep.subr.bf16.mxu0 %v2009_v4  ;;  %v2016_v11 = vld [vmem:[#allocation2 + $0x90] sm:$0xff]   ;;  %v2017_v12 = vld [vmem:[#allocation2 + $0x58] sm:$0xff]   ;;  %v2021_v16 = vld [vmem:[#allocation2 + $0x60] sm:$0xff]  }
  0x19   :  { %1816 = vmatprep.subr.bf16.mxu1 %v2010_v5  ;;  %v2018_v13 = vld [vmem:[#allocation2 + $0xd8] sm:$0xff]   ;;  %v2022_v17 = vld [vmem:[#allocation2 + $0xe0] sm:$0xff]   ;;  %v2025_v20 = vld [vmem:[#allocation2 + $0x68] sm:$0xff]   ;;  %v2276_v35 = vsub.s32 %v50_v29, %v52_v30 }
  0x1a   :  { %v2019_v14 = vld [vmem:[#allocation2 + $0x18] sm:$0xff]   ;;  %v2023_v18 = vld [vmem:[#allocation2 + $0x20] sm:$0xff]   ;;  %v2026_v21 = vld [vmem:[#allocation2 + $0xe8] sm:$0xff]  }
  0x1b   :  { %1795 = vmatpush3.bf16.msra.mxu0 %v2011_v6  ;;  %v2020_v15 = vld [vmem:[#allocation2 + $0x98] sm:$0xff]   ;;  %v2024_v19 = vld [vmem:[#allocation2 + $0xa0] sm:$0xff]   ;;  %v2027_v25 = vld [vmem:[#allocation2 + $0x28] sm:$0xff]  }
  0x1c   :  { %1817 = vmatpush3.bf16.msra.mxu1 %v2012_v7  ;;  %1796 = vmatprep.subr.bf16.mxu0 %v2013_v8  ;;  %v2028_v26 = vld [vmem:[#allocation2 + $0xa8] sm:$0xff]   ;;  %v2029_v27 = vld [vmem:[#allocation2 + $0x70] sm:$0xff]   ;;  %v2033_v33 = vld [vmem:[#allocation2 + $0x78] sm:$0xff]  }
  0x1d   :  { %1818 = vmatprep.subr.bf16.mxu1 %v2014_v9  ;;  %v2030_v28 = vld [vmem:[#allocation2 + $0xf0] sm:$0xff]   ;;  %v2034_v34 = vld [vmem:[#allocation2 + $0xf8] sm:$0xff]   ;;  %v39_v38 = vld [vmem:[%s2356_s0] sm:$0xff] }
  0x1e   :  { %v2031_v31 = vld [vmem:[#allocation2 + $0x30] sm:$0xff]   ;;  %v2035_v36 = vld [vmem:[#allocation2 + $0x38] sm:$0xff]   ;;  %v54_v39 = vrot.slane %v39_v38, %v2276_v35  ;;  %v47_v40 = vcombine.high %v39_v38, %v39_v38  ;;  %v2038_v41 = vld [vmem:[#allocation2 + $0x140] sm:$0xff]  }
  0x1f   :  { %1797 = vmatpush3.bf16.msra.mxu0 %v2015_v10  ;;  %v2032_v32 = vld [vmem:[#allocation2 + $0xb0] sm:$0xff]   ;;  %v2036_v37 = vld [vmem:[#allocation2 + $0xb8] sm:$0xff]   ;;  %v2039_v42 = vld [vmem:[#allocation2 + $0x1c0] sm:$0xff]  }
  0x20   :  { %1819 = vmatpush3.bf16.msra.mxu1 %v2016_v11  ;;  %1798 = vmatprep.subr.bf16.mxu0 %v2017_v12  ;;  %v62_v43 = vcombine.high %v54_v39, %v54_v39  ;;  %v61_v44 = vrot.slane %v47_v40, %v2276_v35  ;;  %v131_v45 = vpack.c.bf16 %v54_v39, %v54_v39  ;;  %v2040_v46 = vld [vmem:[#allocation2 + $0x100] sm:$0xff]   ;;  %v2042_v51 = vld [vmem:[#allocation2 + $0x148] sm:$0xff]   ;;  %v2046_v56 = vld [vmem:[#allocation2 + $0x150] sm:$0xff]  }
  0x21   :  { %1820 = vmatprep.subr.bf16.mxu1 %v2018_v13  ;;  %v2041_v49 = vld [vmem:[#allocation2 + $0x180] sm:$0xff]   ;;  %v2043_v53 = vld [vmem:[#allocation2 + $0x1c8] sm:$0xff]   ;;  %v2047_v57 = vld [vmem:[#allocation2 + $0x1d0] sm:$0xff]  }
  0x22   :  { %v132_v47 = vpack.c.bf16 %v62_v43, %v62_v43  ;;  %v63_v48 = vcombine.high %v61_v44, %v61_v44  ;;  %v133_v50 = vpack.c.bf16 %v61_v44, %v61_v44  ;;  %v2044_v54 = vld [vmem:[#allocation2 + $0x108] sm:$0xff]   ;;  %v2048_v58 = vld [vmem:[#allocation2 + $0x110] sm:$0xff]   ;;  %v2050_v60 = vld [vmem:[#allocation2 + $0x158] sm:$0xff]  }
  0x23   :  { %1799 = vmatpush3.bf16.msra.mxu0 %v2019_v14  ;;  %v2045_v55 = vld [vmem:[#allocation2 + $0x188] sm:$0xff]   ;;  %v2049_v59 = vld [vmem:[#allocation2 + $0x190] sm:$0xff]   ;;  %v2051_v61 = vld [vmem:[#allocation2 + $0x1d8] sm:$0xff]  }
  0x24   :  { %1821 = vmatpush3.bf16.msra.mxu1 %v2020_v15  ;;  %1800 = vmatprep.subr.bf16.mxu0 %v2021_v16  ;;  %v134_v52 = vpack.c.bf16 %v63_v48, %v63_v48  ;;  %v2052_v62 = vld [vmem:[#allocation2 + $0x118] sm:$0xff]   ;;  %v2054_v0 = vld [vmem:[#allocation2 + $0x160] sm:$0xff]   ;;  %v2058_v4 = vld [vmem:[#allocation2 + $0x168] sm:$0xff]  }
  0x25   :  { %1822 = vmatprep.subr.bf16.mxu1 %v2022_v17  ;;  %1210 = vmatprep.mubr.bf16.mxu0 %v132_v47  ;;  %v2053_v63 = vld [vmem:[#allocation2 + $0x198] sm:$0xff]   ;;  %v2055_v1 = vld [vmem:[#allocation2 + $0x1e0] sm:$0xff]   ;;  %v2059_v5 = vld [vmem:[#allocation2 + $0x1e8] sm:$0xff]  }
  0x26   :  { %1250 = vmatprep.mubr.bf16.mxu1 %v134_v52  ;;  %v2056_v2 = vld [vmem:[#allocation2 + $0x120] sm:$0xff]   ;;  %v2060_v6 = vld [vmem:[#allocation2 + $0x128] sm:$0xff]   ;;  %v2062_v8 = vld [vmem:[#allocation2 + $0x170] sm:$0xff]  }
  0x27   :  { %1801 = vmatpush3.bf16.msra.mxu0 %v2023_v18  ;;  %v2057_v3 = vld [vmem:[#allocation2 + $0x1a0] sm:$0xff]   ;;  %v2061_v7 = vld [vmem:[#allocation2 + $0x1a8] sm:$0xff]   ;;  %v2063_v9 = vld [vmem:[#allocation2 + $0x1f0] sm:$0xff]  }
  0x28   :  { %1823 = vmatpush3.bf16.msra.mxu1 %v2024_v19  ;;  %1802 = vmatprep.subr.bf16.mxu0 %v2025_v20  ;;  %v2064_v10 = vld [vmem:[#allocation2 + $0x130] sm:$0xff]   ;;  %v2066_v12 = vld [vmem:[#allocation2 + $0x178] sm:$0xff]   ;;  %v40_v15 = vld [vmem:[%s2356_s0 + $0x8] sm:$0xff] }
  0x29   :  { %1824 = vmatprep.subr.bf16.mxu1 %v2026_v21  ;;  %v2065_v11 = vld [vmem:[#allocation2 + $0x1b0] sm:$0xff]   ;;  %v2067_v13 = vld [vmem:[#allocation2 + $0x1f8] sm:$0xff]   ;;  %v71_v17 = vrot.slane %v40_v15, %v2276_v35  ;;  %v64_v18 = vcombine.high %v40_v15, %v40_v15  ;;  %v2071_v19 = vld [vmem:[#allocation2 + $0x240] sm:$0xff]  }
  0x2a   :  { %v2068_v14 = vld [vmem:[#allocation2 + $0x138] sm:$0xff]   ;;  %v2072_v22 = vld [vmem:[#allocation2 + $0x2c0] sm:$0xff]   ;;  %v2075_v29 = vld [vmem:[#allocation2 + $0x248] sm:$0xff]  }
  0x2b   :  { %1803 = vmatpush3.bf16.msra.mxu0 %v2027_v25  ;;  %v2069_v16 = vld [vmem:[#allocation2 + $0x1b8] sm:$0xff]   ;;  %v79_v20 = vcombine.high %v71_v17, %v71_v17  ;;  %v78_v21 = vrot.slane %v64_v18, %v2276_v35  ;;  %v135_v23 = vpack.c.bf16 %v71_v17, %v71_v17  ;;  %v2073_v24 = vld [vmem:[#allocation2 + $0x200] sm:$0xff]   ;;  %v2082_v38 = vld [vmem:[#allocation2 + $0x290] sm:$0xff]  }
  0x2c   :  { %1825 = vmatpush3.bf16.msra.mxu1 %v2028_v26  ;;  %1804 = vmatprep.subr.bf16.mxu0 %v2029_v27  ;;  %v2074_v27 = vld [vmem:[#allocation2 + $0x280] sm:$0xff]   ;;  %v2083_v39 = vld [vmem:[#allocation2 + $0x258] sm:$0xff]   ;;  %v2091_v47 = vld [vmem:[#allocation2 + $0x268] sm:$0xff]  }
  0x2d   :  { %1826 = vmatprep.subr.bf16.mxu1 %v2030_v28  ;;  %v136_v25 = vpack.c.bf16 %v79_v20, %v79_v20  ;;  %v80_v26 = vcombine.high %v78_v21, %v78_v21  ;;  %v137_v28 = vpack.c.bf16 %v78_v21, %v78_v21  ;;  %v2084_v40 = vld [vmem:[#allocation2 + $0x2d8] sm:$0xff]   ;;  %v2087_v43 = vld [vmem:[#allocation2 + $0x260] sm:$0xff]   ;;  %v2092_v48 = vld [vmem:[#allocation2 + $0x2e8] sm:$0xff]  }
  0x2e   :  { %v2088_v44 = vld [vmem:[#allocation2 + $0x2e0] sm:$0xff]   ;;  %v2096_v52 = vld [vmem:[#allocation2 + $0x2f0] sm:$0xff]   ;;  %v2116_v17 = vld [vmem:[#allocation2 + $0x358] sm:$0xff]  }
  0x2f   :  { %1805 = vmatpush3.bf16.msra.mxu0 %v2031_v31  ;;  %v138_v30 = vpack.c.bf16 %v80_v26, %v80_v26  ;;  %v2076_v31 = vld [vmem:[#allocation2 + $0x2c8] sm:$0xff]   ;;  %v2114_v15 = vld [vmem:[#allocation2 + $0x310] sm:$0xff]   ;;  %v2117_v18 = vld [vmem:[#allocation2 + $0x3d8] sm:$0xff]  }
  0x30   :  { %1827 = vmatpush3.bf16.msra.mxu1 %v2032_v32  ;;  %1806 = vmatprep.subr.bf16.mxu0 %v2033_v33  ;;  %v2077_v32 = vld [vmem:[#allocation2 + $0x208] sm:$0xff]   ;;  %v2119_v20 = vld [vmem:[#allocation2 + $0x398] sm:$0xff]   ;;  %v2120_v21 = vld [vmem:[#allocation2 + $0x360] sm:$0xff]  }
  0x31   :  { %1828 = vmatprep.subr.bf16.mxu1 %v2034_v34  ;;  %v2078_v33 = vld [vmem:[#allocation2 + $0x288] sm:$0xff]   ;;  %v2079_v34 = vld [vmem:[#allocation2 + $0x250] sm:$0xff]  }
  0x32   :  { %v2125_v26 = vld [vmem:[#allocation2 + $0x3e8] sm:$0xff]  }
  0x33   :  { %1807 = vmatpush3.bf16.msra.mxu0 %v2035_v36  ;;  %v2080_v36 = vld [vmem:[#allocation2 + $0x2d0] sm:$0xff]  }
  0x34   :  { %1829 = vmatpush3.bf16.msra.mxu1 %v2036_v37  ;;  %1836 = vmatprep.subr.bf16.mxu0 %v2038_v41  ;;  %v2081_v37 = vld [vmem:[#allocation2 + $0x210] sm:$0xff]   ;;  %v2085_v41 = vld [vmem:[#allocation2 + $0x218] sm:$0xff]  }
  0x35   :  { %1858 = vmatprep.subr.bf16.mxu1 %v2039_v42  ;;  %v2086_v42 = vld [vmem:[#allocation2 + $0x298] sm:$0xff]  }
  0x36   :  { %1211 = vmatmul.mubr.bf16.vlgmr.msra.gmra.mrb[0].mxu0 %v131_v45  ;;  %v2089_v45 = vld [vmem:[#allocation2 + $0x220] sm:$0xff]  }
  0x37   :  { %1837 = vmatpush3.bf16.msra.mxu0 %v2040_v46  ;;  %1251 = vmatmul.mubr.bf16.vlgmr.msra.gmra.mrb[0].mxu1 %v133_v50  ;;  %v2090_v46 = vld [vmem:[#allocation2 + $0x2a0] sm:$0xff]   ;;  %v2094_v50 = vld [vmem:[#allocation2 + $0x2a8] sm:$0xff]  }
  0x38   :  { %1838 = vmatprep.subr.bf16.mxu0 %v2042_v51  ;;  %1859 = vmatpush3.bf16.msra.mxu1 %v2041_v49  ;;  %v2093_v49 = vld [vmem:[#allocation2 + $0x228] sm:$0xff]   ;;  %v2095_v51 = vld [vmem:[#allocation2 + $0x270] sm:$0xff]  }
  0x39   :  { %1860 = vmatprep.subr.bf16.mxu1 %v2043_v53  ;;  %1290 = vmatprep.mubr.bf16.mxu0 %v136_v25  ;;  %v2097_v53 = vld [vmem:[#allocation2 + $0x230] sm:$0xff]   ;;  %v2124_v25 = vld [vmem:[#allocation2 + $0x368] sm:$0xff]  }
  0x3a   :  { %1330 = vmatprep.mubr.bf16.mxu1 %v138_v30  ;;  %v2129_v30 = vld [vmem:[#allocation2 + $0x3f0] sm:$0xff]  }
  0x3b   :  { %1839 = vmatpush3.bf16.msra.mxu0 %v2044_v54  ;;  %v2098_v54 = vld [vmem:[#allocation2 + $0x2b0] sm:$0xff]  }
  0x3c   :  { %1840 = vmatprep.subr.bf16.mxu0 %v2046_v56  ;;  %1861 = vmatpush3.bf16.msra.mxu1 %v2045_v55  ;;  %v2099_v55 = vld [vmem:[#allocation2 + $0x278] sm:$0xff]  }
  0x3d   :  { %1862 = vmatprep.subr.bf16.mxu1 %v2047_v57  ;;  %v2100_v56 = vld [vmem:[#allocation2 + $0x2f8] sm:$0xff]  }
  0x3e   :  { %v2101_v57 = vld [vmem:[#allocation2 + $0x238] sm:$0xff]  }
  0x3f   :  { %1841 = vmatpush3.bf16.msra.mxu0 %v2048_v58  ;;  %v41_v58 = vld [vmem:[%s2356_s0 + $0x10] sm:$0xff] }
  0x40   :  { %1842 = vmatprep.subr.bf16.mxu0 %v2050_v60  ;;  %1863 = vmatpush3.bf16.msra.mxu1 %v2049_v59  ;;  %v2102_v59 = vld [vmem:[#allocation2 + $0x2b8] sm:$0xff]   ;;  %v88_v60 = vrot.slane %v41_v58, %v2276_v35 }
  0x41   :  { %1864 = vmatprep.subr.bf16.mxu1 %v2051_v61  ;;  %v81_v61 = vcombine.high %v41_v58, %v41_v58 }
  0x43   :  { %1843 = vmatpush3.bf16.msra.mxu0 %v2052_v62  ;;  %v2104_v62 = vld [vmem:[#allocation2 + $0x340] sm:$0xff]  }
  0x44   :  { %1844 = vmatprep.subr.bf16.mxu0 %v2054_v0  ;;  %1865 = vmatpush3.bf16.msra.mxu1 %v2053_v63  ;;  %v96_v63 = vcombine.high %v88_v60, %v88_v60  ;;  %v95_v0 = vrot.slane %v81_v61, %v2276_v35 }
  0x45   :  { %1866 = vmatprep.subr.bf16.mxu1 %v2055_v1  ;;  %v2105_v1 = vld [vmem:[#allocation2 + $0x3c0] sm:$0xff]  }
  0x47   :  { %1845 = vmatpush3.bf16.msra.mxu0 %v2056_v2  ;;  %v139_v2 = vpack.c.bf16 %v88_v60, %v88_v60 }
  0x48   :  { %1846 = vmatprep.subr.bf16.mxu0 %v2058_v4  ;;  %1867 = vmatpush3.bf16.msra.mxu1 %v2057_v3  ;;  %v2106_v3 = vld [vmem:[#allocation2 + $0x300] sm:$0xff]   ;;  %v140_v4 = vpack.c.bf16 %v96_v63, %v96_v63 }
  0x49   :  { %1868 = vmatprep.subr.bf16.mxu1 %v2059_v5  ;;  %v97_v5 = vcombine.high %v95_v0, %v95_v0 }
  0x4b   :  { %1847 = vmatpush3.bf16.msra.mxu0 %v2060_v6  ;;  %v2107_v6 = vld [vmem:[#allocation2 + $0x380] sm:$0xff]  }
  0x4c   :  { %1848 = vmatprep.subr.bf16.mxu0 %v2062_v8  ;;  %1869 = vmatpush3.bf16.msra.mxu1 %v2061_v7  ;;  %v141_v7 = vpack.c.bf16 %v95_v0, %v95_v0  ;;  %v2108_v8 = vld [vmem:[#allocation2 + $0x348] sm:$0xff]  }
  0x4d   :  { %1870 = vmatprep.subr.bf16.mxu1 %v2063_v9  ;;  %v142_v9 = vpack.c.bf16 %v97_v5, %v97_v5 }
  0x4f   :  { %1849 = vmatpush3.bf16.msra.mxu0 %v2064_v10  ;;  %v2109_v10 = vld [vmem:[#allocation2 + $0x3c8] sm:$0xff]  }
  0x50   :  { %1850 = vmatprep.subr.bf16.mxu0 %v2066_v12  ;;  %1871 = vmatpush3.bf16.msra.mxu1 %v2065_v11  ;;  %v2110_v11 = vld [vmem:[#allocation2 + $0x308] sm:$0xff]  }
  0x51   :  { %1872 = vmatprep.subr.bf16.mxu1 %v2067_v13  ;;  %v2111_v12 = vld [vmem:[#allocation2 + $0x388] sm:$0xff]   ;;  %v2112_v13 = vld [vmem:[#allocation2 + $0x350] sm:$0xff]  }
  0x53   :  { %1851 = vmatpush3.bf16.msra.mxu0 %v2068_v14  ;;  %v2113_v14 = vld [vmem:[#allocation2 + $0x3d0] sm:$0xff]  }
  0x54   :  { %1880 = vmatprep.subr.bf16.mxu0 %v2071_v19  ;;  %1873 = vmatpush3.bf16.msra.mxu1 %v2069_v16  ;;  %v2115_v16 = vld [vmem:[#allocation2 + $0x390] sm:$0xff]   ;;  %v2118_v19 = vld [vmem:[#allocation2 + $0x318] sm:$0xff]  }
  0x55   :  { %1902 = vmatprep.subr.bf16.mxu1 %v2072_v22  ;;  %v2121_v22 = vld [vmem:[#allocation2 + $0x3e0] sm:$0xff]  }
  0x56   :  { %1291 = vmatmul.mubr.bf16.vlgmr.msra.gmra.mrb[4].mxu0 %v135_v23  ;;  %v2122_v23 = vld [vmem:[#allocation2 + $0x320] sm:$0xff]  }
  0x57   :  { %1881 = vmatpush3.bf16.msra.mxu0 %v2073_v24  ;;  %1331 = vmatmul.mubr.bf16.vlgmr.msra.gmra.mrb[4].mxu1 %v137_v28  ;;  %v2123_v24 = vld [vmem:[#allocation2 + $0x3a0] sm:$0xff]   ;;  %v2127_v28 = vld [vmem:[#allocation2 + $0x3a8] sm:$0xff]  }
  0x58   :  { %1882 = vmatprep.subr.bf16.mxu0 %v2075_v29  ;;  %1903 = vmatpush3.bf16.msra.mxu1 %v2074_v27  ;;  %v2126_v27 = vld [vmem:[#allocation2 + $0x328] sm:$0xff]   ;;  %v2128_v29 = vld [vmem:[#allocation2 + $0x370] sm:$0xff]  }
  0x59   :  { %1904 = vmatprep.subr.bf16.mxu1 %v2076_v31  ;;  %1370 = vmatprep.mubr.bf16.mxu0 %v140_v4  ;;  %v2130_v31 = vld [vmem:[#allocation2 + $0x330] sm:$0xff]  }
  0x5a   :  { %1410 = vmatprep.mubr.bf16.mxu1 %v142_v9 }
  0x5b   :  { %1883 = vmatpush3.bf16.msra.mxu0 %v2077_v32  ;;  %v2131_v32 = vld [vmem:[#allocation2 + $0x3b0] sm:$0xff]  }
  0x5c   :  { %1884 = vmatprep.subr.bf16.mxu0 %v2079_v34  ;;  %1905 = vmatpush3.bf16.msra.mxu1 %v2078_v33  ;;  %v2132_v33 = vld [vmem:[#allocation2 + $0x378] sm:$0xff]  }
  0x5d   :  { %1906 = vmatprep.subr.bf16.mxu1 %v2080_v36  ;;  %v2133_v34 = vld [vmem:[#allocation2 + $0x3f8] sm:$0xff]  }
  0x5e   :  { %v2134_v36 = vld [vmem:[#allocation2 + $0x338] sm:$0xff]  }
  0x5f   :  { %1885 = vmatpush3.bf16.msra.mxu0 %v2081_v37  ;;  %v2135_v37 = vld [vmem:[#allocation2 + $0x3b8] sm:$0xff]  }
  0x60   :  { %1886 = vmatprep.subr.bf16.mxu0 %v2083_v39  ;;  %1907 = vmatpush3.bf16.msra.mxu1 %v2082_v38  ;;  %v42_v38 = vld [vmem:[%s2356_s0 + $0x18] sm:$0xff] }
  0x61   :  { %1908 = vmatprep.subr.bf16.mxu1 %v2084_v40  ;;  %v105_v39 = vrot.slane %v42_v38, %v2276_v35  ;;  %v98_v40 = vcombine.high %v42_v38, %v42_v38 }
  0x63   :  { %1887 = vmatpush3.bf16.msra.mxu0 %v2085_v41  ;;  %v113_v41 = vcombine.high %v105_v39, %v105_v39 }
  0x64   :  { %1888 = vmatprep.subr.bf16.mxu0 %v2087_v43  ;;  %1909 = vmatpush3.bf16.msra.mxu1 %v2086_v42  ;;  %v112_v42 = vrot.slane %v98_v40, %v2276_v35  ;;  %v143_v43 = vpack.c.bf16 %v105_v39, %v105_v39  ;;  %v2138_v35 = vld [vmem:[%s2359_s3 + $0x8] sm:$0xff]  }
  0x65   :  { %1910 = vmatprep.subr.bf16.mxu1 %v2088_v44  ;;  %v144_v44 = vpack.c.bf16 %v113_v41, %v113_v41 }
  0x67   :  { %1889 = vmatpush3.bf16.msra.mxu0 %v2089_v45  ;;  %v114_v45 = vcombine.high %v112_v42, %v112_v42 }
  0x68   :  { %1890 = vmatprep.subr.bf16.mxu0 %v2091_v47  ;;  %1911 = vmatpush3.bf16.msra.mxu1 %v2090_v46  ;;  %v145_v46 = vpack.c.bf16 %v112_v42, %v112_v42 }
  0x69   :  { %1912 = vmatprep.subr.bf16.mxu1 %v2092_v48  ;;  %v146_v47 = vpack.c.bf16 %v114_v45, %v114_v45  ;;  %v2137_v48 = vld [vmem:[%s2359_s3] sm:$0xff]  }
  0x6b   :  { %1891 = vmatpush3.bf16.msra.mxu0 %v2093_v49  ;;  %v2225_v49 = vmov 0.0  }
  0x6c   :  { %1892 = vmatprep.subr.bf16.mxu0 %v2095_v51  ;;  %1913 = vmatpush3.bf16.msra.mxu1 %v2094_v50  ;;  %v2139_v50 = vld [vmem:[%s2359_s3 + $0x10] sm:$0xff]   ;;  %v2140_v51 = vld [vmem:[%s2359_s3 + $0x18] sm:$0xff]  }
  0x6d   :  { %1914 = vmatprep.subr.bf16.mxu1 %v2096_v52  ;;  %v2141_v52 = vld [vmem:[%s2359_s3 + $0x20] sm:$0xff]  }
  0x6f   :  { %1893 = vmatpush3.bf16.msra.mxu0 %v2097_v53  ;;  %v2142_v53 = vld [vmem:[%s2359_s3 + $0x28] sm:$0xff]  }
  0x70   :  { %1894 = vmatprep.subr.bf16.mxu0 %v2099_v55  ;;  %1915 = vmatpush3.bf16.msra.mxu1 %v2098_v54  ;;  %v2143_v54 = vld [vmem:[%s2359_s3 + $0x30] sm:$0xff]   ;;  %v2144_v55 = vld [vmem:[%s2359_s3 + $0x38] sm:$0xff]  }
  0x71   :  { %1916 = vmatprep.subr.bf16.mxu1 %v2100_v56 }
  0x73   :  { %1895 = vmatpush3.bf16.msra.mxu0 %v2101_v57  ;;  %v1654_v57 = vld [vmem:[%s2358_s2] ss:$0 sm:$0xff] }
  0x74   :  { %1924 = vmatprep.subr.bf16.mxu0 %v2104_v62  ;;  %1917 = vmatpush3.bf16.msra.mxu1 %v2102_v59 }
  0x75   :  { %1946 = vmatprep.subr.bf16.mxu1 %v2105_v1 }
  0x76   :  { %1371 = vmatmul.mubr.bf16.vlgmr.msra.gmra.mrb[8].mxu0 %v139_v2 }
  0x77   :  { %1925 = vmatpush3.bf16.msra.mxu0 %v2106_v3  ;;  %1411 = vmatmul.mubr.bf16.vlgmr.msra.gmra.mrb[8].mxu1 %v141_v7 }
  0x78   :  { %1926 = vmatprep.subr.bf16.mxu0 %v2108_v8  ;;  %1947 = vmatpush3.bf16.msra.mxu1 %v2107_v6 }
  0x79   :  { %1948 = vmatprep.subr.bf16.mxu1 %v2109_v10  ;;  %1450 = vmatprep.mubr.bf16.mxu0 %v144_v44  ;;  %v1783_v44 = vld [vmem:[%s2360_s4] ss:$0 sm:$0xff]  ;;  %s2227_s4 = smov [#allocation5]  }
  0x7a   :  { %1490 = vmatprep.mubr.bf16.mxu1 %v146_v47  ;;  %s1631_s1 = sshll.u32 %s2227_s4, 4  ;;  %s1632_s1 = int_to_ptr.vmem [resolvable:$true] %s1631_s1 }
  0x7b   :  { %1927 = vmatpush3.bf16.msra.mxu0 %v2110_v11  ;;  %s2171_s11 = scalar_lea.vmem %s1632_s1, 32  ;;  %p2176_p9 = scmp.lt.s32.totalorder %s1632_s1, %s1632_s1 }
  0x7c   :  { %1928 = vmatprep.subr.bf16.mxu0 %v2112_v13  ;;  %1949 = vmatpush3.bf16.msra.mxu1 %v2111_v12  ;;  %p2172_p8 = scmp.ne.s32.totalorder %s1632_s1, %s2171_s11  ;;  %p2177_p10 = scmp.lt.s32.totalorder %s2171_s11, %s2171_s11 }
  0x7d   :  { %1950 = vmatprep.subr.bf16.mxu1 %v2113_v14 }
  0x7e   :  { %p2178_p11 = por %p2177_p10, %p2176_p9 }
  0x7f   :  { %1929 = vmatpush3.bf16.msra.mxu0 %v2114_v15 }
  0x80   :  { %1930 = vmatprep.subr.bf16.mxu0 %v2116_v17  ;;  %1951 = vmatpush3.bf16.msra.mxu1 %v2115_v16  ;;  %p2179_p12 = pnand %p2178_p11, %p2172_p8 }
  0x81   :  { %1952 = vmatprep.subr.bf16.mxu1 %v2117_v18 }
  0x83   :  { %1931 = vmatpush3.bf16.msra.mxu0 %v2118_v19 }
  0x84   :  { %1932 = vmatprep.subr.bf16.mxu0 %v2120_v21  ;;  %1953 = vmatpush3.bf16.msra.mxu1 %v2119_v20 }
  0x85   :  { %1954 = vmatprep.subr.bf16.mxu1 %v2121_v22 }
  0x87   :  { %1933 = vmatpush3.bf16.msra.mxu0 %v2122_v23 }
  0x88   :  { %1934 = vmatprep.subr.bf16.mxu0 %v2124_v25  ;;  %1955 = vmatpush3.bf16.msra.mxu1 %v2123_v24 }
  0x89   :  { %1956 = vmatprep.subr.bf16.mxu1 %v2125_v26 }
  0x8b   :  { %1935 = vmatpush3.bf16.msra.mxu0 %v2126_v27 }
  0x8c   :  { %1936 = vmatprep.subr.bf16.mxu0 %v2128_v29  ;;  %1957 = vmatpush3.bf16.msra.mxu1 %v2127_v28 }
  0x8d   :  { %1958 = vmatprep.subr.bf16.mxu1 %v2129_v30 }
  0x8f   :  { %1937 = vmatpush3.bf16.msra.mxu0 %v2130_v31 }
  0x90   :  { %1938 = vmatprep.subr.bf16.mxu0 %v2132_v33  ;;  %1959 = vmatpush3.bf16.msra.mxu1 %v2131_v32 }
  0x91   :  { %1960 = vmatprep.subr.bf16.mxu1 %v2133_v34 }
  0x93   :  { %1939 = vmatpush3.bf16.msra.mxu0 %v2134_v36 }
  0x94   :  { %1961 = vmatpush3.bf16.msra.mxu1 %v2135_v37  ;;  %1977 = vmatprep.subr.bf16.mxu0 %v2225_v49 }
  0x96   :  { %1451 = vmatmul.mubr.bf16.vlgmr.msra.gmra.mrb[12].mxu0 %v143_v43 }
  0x97   :  { %1491 = vmatmul.mubr.bf16.vlgmr.msra.gmra.mrb[12].mxu1 %v145_v46  ;;  %1978 = vmatpush3.bf16.msra.mxu0 %v2137_v48 }
  0x98   :  { %1979 = vmatprep.subr.bf16.mxu0 %v2225_v49  ;;  %1993 = vmatprep.mubr.msk.bf16.mxu0 %vm2226_vm0, %v2225_v49 }
  0x9b   :  { %1980 = vmatpush3.bf16.msra.mxu0 %v2138_v35 }
  0x9c   :  { %1981 = vmatprep.subr.bf16.mxu0 %v2225_v49 }
  0x9f   :  { %1982 = vmatpush3.bf16.msra.mxu0 %v2139_v50 }
  0xa0   :  { %1983 = vmatprep.subr.bf16.mxu0 %v2225_v49 }
  0xa3   :  { %1984 = vmatpush3.bf16.msra.mxu0 %v2140_v51 }
  0xa4   :  { %1985 = vmatprep.subr.bf16.mxu0 %v2225_v49 }
  0xa7   :  { %1986 = vmatpush3.bf16.msra.mxu0 %v2141_v52 }
  0xa8   :  { %1987 = vmatprep.subr.bf16.mxu0 %v2225_v49 }
  0xab   :  { %1988 = vmatpush3.bf16.msra.mxu0 %v2142_v53 }
  0xac   :  { %1989 = vmatprep.subr.bf16.mxu0 %v2225_v49 }
  0xaf   :  { %1990 = vmatpush3.bf16.msra.mxu0 %v2143_v54 }
  0xb0   :  { %1991 = vmatprep.subr.bf16.mxu0 %v2225_v49 }
  0xb3   :  { %1992 = vmatpush3.bf16.msra.mxu0 %v2144_v55 }
 0x109   :  { %v1808_v56 = vpop.f32.mrb[0].mxu0 }
 0x10a   :  { %v1809_v58 = vpop.f32.mrb[1].mxu0  ;;  %v1830_v59 = vpop.f32.mrb[0].mxu1 }
 0x10b   :  { %v1810_v60 = vadd.f32 %v1809_v58, %v1808_v56  ;;  %v1811_v61 = vpop.f32.mrb[2].mxu0  ;;  %v1831_v62 = vpop.f32.mrb[1].mxu1 }
 0x10c   :  { %v1812_v63 = vpop.f32.mrb[3].mxu0  ;;  %v1832_v1 = vadd.f32 %v1831_v62, %v1830_v59  ;;  %v1833_v2 = vpop.f32.mrb[2].mxu1 }
 0x10d   :  { %v1213_v0 = vadd.f32 %v1810_v60, %v1654_v57  ;;  %v1834_v3 = vpop.f32.mrb[3].mxu1 }
 0x10f   :  { %v1253_v4 = vadd.f32 %v1832_v1, %v1213_v0 }
 0x129   :  { %v1852_v5 = vpop.f32.mrb[4].mxu0 }
 0x12a   :  { %v1853_v6 = vpop.f32.mrb[5].mxu0  ;;  %v1874_v7 = vpop.f32.mrb[4].mxu1 }
 0x12b   :  { %v1854_v8 = vadd.f32 %v1853_v6, %v1852_v5  ;;  %v1855_v9 = vpop.f32.mrb[6].mxu0  ;;  %v1875_v10 = vpop.f32.mrb[5].mxu1 }
 0x12c   :  { %v1856_v11 = vpop.f32.mrb[7].mxu0  ;;  %v1876_v13 = vadd.f32 %v1875_v10, %v1874_v7  ;;  %v1877_v14 = vpop.f32.mrb[6].mxu1 }
 0x12d   :  { %v1293_v12 = vadd.f32 %v1854_v8, %v1253_v4  ;;  %v1878_v15 = vpop.f32.mrb[7].mxu1 }
 0x12f   :  { %v1333_v16 = vadd.f32 %v1876_v13, %v1293_v12 }
 0x149   :  { %v1896_v17 = vpop.f32.mrb[8].mxu0 }
 0x14a   :  { %v1897_v18 = vpop.f32.mrb[9].mxu0  ;;  %v1918_v19 = vpop.f32.mrb[8].mxu1 }
 0x14b   :  { %v1898_v20 = vadd.f32 %v1897_v18, %v1896_v17  ;;  %v1899_v21 = vpop.f32.mrb[10].mxu0  ;;  %v1919_v22 = vpop.f32.mrb[9].mxu1 }
 0x14c   :  { %v1900_v23 = vpop.f32.mrb[11].mxu0  ;;  %v1920_v25 = vadd.f32 %v1919_v22, %v1918_v19  ;;  %v1921_v26 = vpop.f32.mrb[10].mxu1 }
 0x14d   :  { %v1373_v24 = vadd.f32 %v1898_v20, %v1333_v16  ;;  %v1922_v27 = vpop.f32.mrb[11].mxu1 }
 0x14f   :  { %v1413_v28 = vadd.f32 %v1920_v25, %v1373_v24 }
 0x169   :  { %v1940_v29 = vpop.f32.mrb[12].mxu0 }
 0x16a   :  { %v1941_v30 = vpop.f32.mrb[13].mxu0  ;;  %v1962_v31 = vpop.f32.mrb[12].mxu1 }
 0x16b   :  { %v1942_v32 = vadd.f32 %v1941_v30, %v1940_v29  ;;  %v1943_v33 = vpop.f32.mrb[14].mxu0  ;;  %v1963_v34 = vpop.f32.mrb[13].mxu1 }
 0x16c   :  { %v1944_v36 = vpop.f32.mrb[15].mxu0  ;;  %v1964_v38 = vadd.f32 %v1963_v34, %v1962_v31  ;;  %v1965_v39 = vpop.f32.mrb[14].mxu1 }
 0x16d   :  { %v1453_v37 = vadd.f32 %v1942_v32, %v1413_v28  ;;  %v1966_v40 = vpop.f32.mrb[15].mxu1 }
 0x16f   :  { %v1493_v41 = vadd.f32 %v1964_v38, %v1453_v37 }
 0x171   :  { %v1498_v42 = vmax.f32 %v1493_v41, 0.0 }
 0x173   :  { %v1499_v43 = vpack.c.bf16 %v1498_v42, %v1498_v42 }
 0x175   :  { %1994 = vmatmul.mubr.bf16.vlgmr.msra.gmra.mrb[16].mxu0 %v1499_v43 }
 0x248   :  { %v1605_v45 = vpop.f32.mrb[16].mxu0 }
 0x249   :  { %v1606_v46 = vadd.f32 %v1783_v44, %v1605_v45  ;;  %v1995_v47 = vpop.f32.mrb[17].mxu0 }
 0x24a   :  { %v1608_v48 = vpop.f32.mrb[18].mxu0 }
 0x24b   :  { %v1996_v49 = vpop.f32.mrb[19].mxu0  ;;  %v1612_v35 = vsel %vm1611_vm1, %v1606_v46, -inf  ;;  %1623 = vst.msk [vmem:[#allocation5] sm:$0x3] %vm1611_vm1, %v1606_v46 }
 0x24c   :  { %1613 = vmax.xlane.f32.xlu0 %v1612_v35 }
 0x2d9   :  { %v1614_v50 = vpop.xlane.xlu0 %1613 }
 0x2da   :  { %v1615_v51 = vsub.f32 %v1606_v46, %v1614_v50 }
 0x2dc   :  { %v1616_v52 = vmul.f32 1.442695, %v1615_v51 }
 0x2de   :  { %2145 = vpow2.f32 %v1616_v52 }
 0x2e8   :  { %v2146_v53 = vpop.eup %2145 }
 0x2e9   :  { %v1618_v54 = vsel %vm1611_vm1, %v2146_v53, 0.0 }
 0x2ea   :  { %1619 = vadd.xlane.f32.xlu0 %v1618_v54 }
 0x2eb   :  { %2182 = shalt.err (!%p2179_p12)
}
 0x2ec   :  { %s2183_s14 = scalar_lea.hbm %s2361_s5, 32 }
 0x2ed   :  { %p2184_p13 = scmp.ne.s32.totalorder %s2361_s5, %s2183_s14  ;;  %p2187_p0 = scmp.lt.u32.totalorder %s2183_s14, %s2361_s5 }
 0x2ef   :  { %p2189_p1 = pnand %p2187_p0, %p2184_p13 }
 0x2f1   :  { %2192 = shalt.err (!%p2189_p1)
}
 0x2f2   :  { %1634 = dma.vmem_to_hbm [thread:$0]  %s1632_s1, 32, %s2361_s5, [#allocation4]  }
 0x2f3   :  { %s2228_s20 = smov [#allocation6]  }
 0x2f4   :  { %s1641_s21 = sshll.u32 %s2228_s20, 4  ;;  %s1642_s21 = int_to_ptr.vmem [resolvable:$true] %s1641_s21 }
 0x2f5   :  { %s2193_s22 = scalar_lea.vmem %s1642_s21, 32  ;;  %p2198_p3 = scmp.lt.s32.totalorder %s1642_s21, %s1642_s21 }
 0x2f6   :  { %p2194_p2 = scmp.ne.s32.totalorder %s1642_s21, %s2193_s22  ;;  %p2199_p4 = scmp.lt.s32.totalorder %s2193_s22, %s2193_s22 }
 0x2f8   :  { %p2200_p5 = por %p2199_p4, %p2198_p3 }
 0x2fa   :  { %p2201_p6 = pnand %p2200_p5, %p2194_p2 }
 0x377   :  { %v1620_v55 = vpop.xlane.xlu0 %1619 }
 0x378   :  { %2147 = vrcp.f32 %v1620_v55 }
 0x382   :  { %v2148_v56 = vpop.eup %2147 }
 0x383   :  { %v1622_v57 = vmul.f32 %v2148_v56, %v2146_v53 }
 0x385   :  { %1624 = vst.msk [vmem:[#allocation6] sm:$0x3] %vm1611_vm1, %v1622_v57 }
 0x386   :  { %2204 = shalt.err (!%p2201_p6)
}
 0x387   :  { %s2205_s5 = scalar_lea.hbm %s2362_s6, 32 }
 0x388   :  { %p2206_p7 = scmp.ne.s32.totalorder %s2362_s6, %s2205_s5  ;;  %p2209_p8 = scmp.lt.u32.totalorder %s2205_s5, %s2362_s6 }
 0x38a   :  { %p2211_p9 = pnand %p2209_p8, %p2206_p7 }
 0x38c   :  { %2214 = shalt.err (!%p2211_p9)
}
 0x38d   :  { %1644 = dma.vmem_to_hbm [thread:$0]  %s1642_s21, 32, %s2362_s6, [#allocation7]  }
 0x38e   :  { %2217 = dma.done.wait [#allocation4], 32  }
 0x38f   :  { %2218 = vsyncadd [#allocation4], 4294967264 }
 0x390   :  { %2219 = dma.done.wait [#allocation7], 32  }
 0x391   :  { %2220 = vsyncadd [#allocation7], 4294967264 }
 0x392   :  { %1651 = vsyncpa [#allocation3], 1 }
 0x393   :  { %1652 = vsyncpa [#allocation4], 1 }
 0x394   :  { %1653 = vsyncpa [#allocation7], 1 }

</bundles_post_ra>
